<compile_context>
chip_gen: v7x
topology: tpu7x:2x2x1
jax: 0.10.0
libtpu: 0.0.40
codegen_flags: <defaults>
</compile_context>

<pallas_src>
import jax
import jax.numpy as jnp
from jax.experimental import pallas as pl
from jax.experimental.pallas import tpu as pltpu

LN_EPS = 1e-5  # PyTorch nn.LayerNorm default
LANE = 128
SUBLANE = 8


def _round_up(a, b):
    return (a + b - 1) // b * b


def _round_down(a, b):
    return (a // b) * b


def _make_resident_kernel(inv_h: float):
    """Resident-weight kernel.

    NOTE: inv_h MUST be 1/H (real hidden size), NOT 1/Hp.  Padded lanes of x,
    gamma, beta, bias and padded weight rows/cols are zero, so the sums over
    Hp lanes equal the sums over the H real lanes and the math stays exact.
    """

    def kernel(x_ref, gamma_ref, beta_ref, w_ref, b_ref, o_ref):
        # x_ref: [TM, Hp]   gamma/beta/b: [1, Hp]   w: [Hp, Hp]
        xf = x_ref[...].astype(jnp.float32)

        # --- LayerNorm (single-pass, f32 statistics) ----------------------
        s1 = jnp.sum(xf, axis=-1, keepdims=True)
        s2 = jnp.sum(xf * xf, axis=-1, keepdims=True)
        mean = s1 * inv_h
        var = jnp.maximum(s2 * inv_h - mean * mean, 0.0)  # guard cancellation
        inv_std = jax.lax.rsqrt(var + LN_EPS)              # EUP
        y = (xf - mean) * inv_std
        y = (y * gamma_ref[...].astype(jnp.float32)
             + beta_ref[...].astype(jnp.float32))

        # --- wrapped layer: dense projection on the MXU -------------------
        y = jnp.dot(y.astype(w_ref.dtype), w_ref[...],
                    preferred_element_type=jnp.float32)
        y = y + b_ref[...].astype(jnp.float32)

        # --- residual: x + layer(layer_norm(x)) ---------------------------
        # Re-read x_ref (already in VMEM) instead of keeping the big f32 copy
        # `xf` live across the matmul -> less vreg/VMEM pressure.
        o_ref[...] = (x_ref[...].astype(jnp.float32) + y).astype(o_ref.dtype)

    return kernel


def _make_streaming_kernel(inv_h: float, tn: int):
    """Weight-streaming kernel: grid=(row tiles, col tiles of the weight)."""

    def kernel(x_ref, gamma_ref, beta_ref, w_ref, b_ref, o_ref, y_ref):
        # x_ref: [TM, Hp]  gamma/beta: [1, Hp]  w_ref: [Hp, TN]  b_ref: [1, TN]
        # o_ref: [TM, TN]  y_ref (scratch, persists over j): [TM, Hp]
        j = pl.program_id(1)

        @pl.when(j == 0)
        def _():
            xf = x_ref[...].astype(jnp.float32)
            s1 = jnp.sum(xf, axis=-1, keepdims=True)
            s2 = jnp.sum(xf * xf, axis=-1, keepdims=True)
            mean = s1 * inv_h
            var = jnp.maximum(s2 * inv_h - mean * mean, 0.0)
            inv_std = jax.lax.rsqrt(var + LN_EPS)
            y = (xf - mean) * inv_std
            y = (y * gamma_ref[...].astype(jnp.float32)
                 + beta_ref[...].astype(jnp.float32))
            y_ref[...] = y.astype(y_ref.dtype)

        yj = jnp.dot(y_ref[...], w_ref[...], preferred_element_type=jnp.float32)
        yj = yj + b_ref[...].astype(jnp.float32)

        off = pl.multiple_of(j * tn, tn)
        xres = x_ref[:, pl.ds(off, tn)].astype(jnp.float32)
        o_ref[...] = (xres + yj).astype(o_ref.dtype)

    return kernel


def pre_post_processing_wrapper(x, gamma, beta, w, b, *, tm=1024,
                                matmul_dtype=None, force_stream=False,
                                stream_tn=None):
    """x: [B, S, H]; gamma, beta, b: [H]; w: [H, H] (applied as y @ w).

    matmul_dtype: optionally cast the weight (and LN output) to e.g.
    jnp.bfloat16 for the bf16-native MXU; default keeps the module's dtype.
    """
    B, S, H = x.shape
    M = B * S
    out_dtype = x.dtype

    if matmul_dtype is not None:
        w = w.astype(matmul_dtype)

    # Lane-dense hidden.  Skip all host-side padding (2 extra HBM passes over
    # the activations) when shapes are already tile-aligned.
    Hp = max(LANE, _round_up(H, LANE))
    need_col_pad = (Hp != H)
    need_row_pad = (M % SUBLANE != 0)
    Mp = _round_up(M, SUBLANE) if need_row_pad else M

    x2 = x.reshape(M, H)
    if need_col_pad or need_row_pad:
        x2 = jnp.pad(x2, ((0, Mp - M), (0, Hp - H)))
    if need_col_pad:
        gamma2 = jnp.pad(gamma, (0, Hp - H))
        beta2 = jnp.pad(beta, (0, Hp - H))
        bias2 = jnp.pad(b, (0, Hp - H))
        w2 = jnp.pad(w, ((0, Hp - H), (0, Hp - H)))
    else:
        gamma2, beta2, bias2, w2 = gamma, beta, b, w
    gamma2 = gamma2.reshape(1, Hp)
    beta2 = beta2.reshape(1, Hp)
    bias2 = bias2.reshape(1, Hp)

    x_isz = jnp.dtype(x.dtype).itemsize
    w_isz = jnp.dtype(w2.dtype).itemsize

    # Generation-aware VMEM budget (v5e/v6e: 128 MiB, v7x: 64 MiB).
    try:
        vmem_cap = int(pltpu.get_tpu_info().vmem_capacity_bytes)
    except Exception:
        vmem_cap = 64 * 1024 * 1024
    budget = int(0.70 * vmem_cap)

    def est_resident(tm_rows):
        return (4 * tm_rows * Hp * x_isz      # x + out, double-buffered
                + Hp * Hp * w_isz             # resident weight, single buffer
                + 3 * tm_rows * Hp * 4        # f32 intermediates
                + 6 * Hp * 4)                 # gamma/beta/bias

    def est_stream(tm_rows, tn):
        return (2 * tm_rows * Hp * x_isz      # x, double-buffered
                + 2 * tm_rows * tn * x_isz    # out, double-buffered
                + 2 * Hp * tn * w_isz         # streamed weight columns
                + tm_rows * Hp * w_isz        # LN scratch
                + 2 * tm_rows * Hp * 4        # f32 intermediates (LN pass)
                + 6 * Hp * 4)

    # Row-tile selection.
    TM = max(SUBLANE, _round_down(tm, SUBLANE))
    TM = min(TM, Mp)
    if Mp >= 4 * 128:
        # Keep >= ~4 row steps: megacore sharding on v7x + DMA/compute overlap.
        TM = min(TM, max(128, _round_down(Mp // 4, SUBLANE)))

    # Stream the weight when keeping it resident would force tiny row tiles.
    stream = force_stream or (est_resident(min(TM, 128)) > budget)

    if stream:
        if stream_tn is not None:
            TN = stream_tn
        else:
            TN = 512 if Hp % 512 == 0 else (256 if Hp % 256 == 0 else 128)
        assert Hp % TN == 0
        while TM > SUBLANE and est_stream(TM, TN) > budget:
            TM = max(SUBLANE, _round_down(TM // 2, SUBLANE))
        grid = (pl.cdiv(Mp, TM), Hp // TN)
        est = est_stream(TM, TN)
        kernel = _make_streaming_kernel(1.0 / H, TN)
        semantics = ("parallel", "arbitrary")
    else:
        while TM > SUBLANE and est_resident(TM) > budget:
            TM = max(SUBLANE, _round_down(TM // 2, SUBLANE))
        grid = (pl.cdiv(Mp, TM),)
        est = est_resident(TM)
        kernel = _make_resident_kernel(1.0 / H)
        semantics = ("parallel",)

    vmem_limit = max(32 * 1024 * 1024, 2 * est)
    vmem_limit = min(vmem_limit, int(0.92 * vmem_cap))
    vmem_limit = min(max(vmem_limit, est + (4 << 20)), vmem_cap)

    cost = pl.CostEstimate(
        flops=2 * Mp * Hp * Hp + 10 * Mp * Hp,
        transcendentals=Mp,
        bytes_accessed=2 * Mp * Hp * x_isz + Hp * Hp * w_isz + 6 * Hp * 4,
    )

    def run(single_buffer_resident):
        def resident_spec(shape, index_map):
            # Constant index map -> one buffer is enough; frees VMEM.
            if single_buffer_resident:
                return pl.BlockSpec(shape, index_map,
                                    pipeline_mode=pl.Buffered(1))
            return pl.BlockSpec(shape, index_map)

        if stream:
            in_specs = [
                pl.BlockSpec((TM, Hp), lambda i, j: (i, 0)),   # x (streamed, i)
                resident_spec((1, Hp), lambda i, j: (0, 0)),   # gamma
                resident_spec((1, Hp), lambda i, j: (0, 0)),   # beta
                pl.BlockSpec((Hp, TN), lambda i, j: (0, j)),   # w (streamed, j)
                pl.BlockSpec((1, TN), lambda i, j: (0, j)),    # bias
            ]
            out_specs = pl.BlockSpec((TM, TN), lambda i, j: (i, j))
            scratch = [pltpu.VMEM((TM, Hp), w2.dtype)]
        else:
            in_specs = [
                pl.BlockSpec((TM, Hp), lambda i: (i, 0)),      # x (streamed)
                resident_spec((1, Hp), lambda i: (0, 0)),      # gamma
                resident_spec((1, Hp), lambda i: (0, 0)),      # beta
                resident_spec((Hp, Hp), lambda i: (0, 0)),     # w (resident)
                resident_spec((1, Hp), lambda i: (0, 0)),      # bias
            ]
            out_specs = pl.BlockSpec((TM, Hp), lambda i: (i, 0))
            scratch = []

        return pl.pallas_call(
            kernel,
            out_shape=jax.ShapeDtypeStruct((Mp, Hp), out_dtype),
            grid_spec=pltpu.PrefetchScalarGridSpec(
                num_scalar_prefetch=0,
                grid=grid,
                in_specs=in_specs,
                out_specs=out_specs,
                scratch_shapes=scratch,
            ),
            compiler_params=pltpu.CompilerParams(
                dimension_semantics=semantics,
                vmem_limit_bytes=int(vmem_limit),
            ),
            cost_estimate=cost,
        )(x2, gamma2, beta2, w2, bias2)

    try:
        out2 = run(True)
    except Exception:
        # Fallback if pipeline_mode=pl.Buffered(1) is rejected by this jax.
        out2 = run(False)

    if need_col_pad or need_row_pad:
        out2 = out2[:M, :H]
    return out2.reshape(B, S, H)


def reference(x, gamma, beta, w, b):
    xf = x.astype(jnp.float32)
    mean = jnp.mean(xf, axis=-1, keepdims=True)
    var = jnp.mean((xf - mean) ** 2, axis=-1, keepdims=True)
    y = (xf - mean) * jax.lax.rsqrt(var + LN_EPS)
    y = y * gamma + beta
    y = jnp.dot(y, w.astype(jnp.float32),
                precision=jax.lax.Precision.HIGHEST) + b
    return (xf + y).astype(x.dtype)


if __name__ == "__main__":
    key = jax.random.PRNGKey(0)

    # --- Case 1: small module-like shapes (resident-weight path) ----------
    B, S, H = 2, 8, 32
    kx, kw, kb = jax.random.split(key, 3)
    x = jax.random.normal(kx, (B, S, H), dtype=jnp.float32)
    # LayerNorm params: PyTorch default init (weight=1, bias=0).
    gamma = jnp.ones((H,), dtype=jnp.float32)
    beta = jnp.zeros((H,), dtype=jnp.float32)
    # Wrapped dense layer params (uniform like nn.Linear init).
    bound = 1.0 / jnp.sqrt(H)
    w = jax.random.uniform(kw, (H, H), minval=-bound, maxval=bound,
                           dtype=jnp.float32)
    b = jax.random.uniform(kb, (H,), minval=-bound, maxval=bound,
                           dtype=jnp.float32)

    out = jax.block_until_ready(pre_post_processing_wrapper(x, gamma, beta, w, b))
    ref = reference(x, gamma, beta, w, b)
    assert out.shape == (B, S, H)
    assert jnp.allclose(out, ref, atol=1e-4, rtol=1e-4), "resident path mismatch"

    # --- Case 2: lane-aligned H, weight-streaming (N-tiled) path ----------
    B2, S2, H2 = 2, 16, 256
    k1, k2, k3, k4, k5 = jax.random.split(jax.random.PRNGKey(0), 5)
    x2 = jax.random.normal(k1, (B2, S2, H2), dtype=jnp.float32)
    gamma2 = 1.0 + 0.1 * jax.random.normal(k2, (H2,), dtype=jnp.float32)
    beta2 = 0.1 * jax.random.normal(k3, (H2,), dtype=jnp.float32)
    bound2 = 1.0 / jnp.sqrt(H2)
    w2 = jax.random.uniform(k4, (H2, H2), minval=-bound2, maxval=bound2,
                            dtype=jnp.float32)
    b2 = jax.random.uniform(k5, (H2,), minval=-bound2, maxval=bound2,
                            dtype=jnp.float32)

    out2 = jax.block_until_ready(
        pre_post_processing_wrapper(x2, gamma2, beta2, w2, b2,
                                    force_stream=True, stream_tn=128))
    ref2 = reference(x2, gamma2, beta2, w2, b2)
    assert out2.shape == (B2, S2, H2)
    assert jnp.allclose(out2, ref2, atol=1e-4, rtol=1e-4), "streaming path mismatch"

    print("KERNEL_OK")
</pallas_src>

<mosaic_0001>
module attributes {stable_mosaic.version = 11 : i64} {
  func.func @kernel(%arg0: i32, %arg1: memref<16x128xf32, #tpu.memory_space<vmem>>, %arg2: memref<1x128xf32, #tpu.memory_space<vmem>>, %arg3: memref<1x128xf32, #tpu.memory_space<vmem>>, %arg4: memref<128x128xf32, #tpu.memory_space<vmem>>, %arg5: memref<1x128xf32, #tpu.memory_space<vmem>>, %arg6: memref<16x128xf32, #tpu.memory_space<vmem>>) attributes {dimension_semantics = [#tpu.dimension_semantics<parallel>], iteration_bounds = array<i64: 1>, scalar_prefetch = 0 : i64, scratch_operands = 0 : i64, tpu.core_type = #tpu.core_type<tc>, window_params = [{transform_indices = @transform_0, window_bounds = array<i64: 16, 128>}, {pipeline_mode = #tpu.pipeline_mode<synchronous>, transform_indices = @transform_1, window_bounds = array<i64: 1, 128>}, {pipeline_mode = #tpu.pipeline_mode<synchronous>, transform_indices = @transform_2, window_bounds = array<i64: 1, 128>}, {pipeline_mode = #tpu.pipeline_mode<synchronous>, transform_indices = @transform_3, window_bounds = array<i64: 128, 128>}, {pipeline_mode = #tpu.pipeline_mode<synchronous>, transform_indices = @transform_4, window_bounds = array<i64: 1, 128>}, {transform_indices = @transform_5, window_bounds = array<i64: 16, 128>}]} {
    %c0 = arith.constant 0 : index
    %c0_0 = arith.constant 0 : index
    %0 = vector.load %arg1[%c0, %c0_0] : memref<16x128xf32, #tpu.memory_space<vmem>>, vector<16x128xf32>
    %cst = arith.constant dense<0.000000e+00> : vector<16xf32>
    %1 = vector.multi_reduction <add>, %0, %cst [1] : vector<16x128xf32> to vector<16xf32>
    %2 = vector.shape_cast %1 : vector<16xf32> to vector<16x1xf32>
    %3 = arith.mulf %0, %0 : vector<16x128xf32>
    %cst_1 = arith.constant dense<0.000000e+00> : vector<16xf32>
    %4 = vector.multi_reduction <add>, %3, %cst_1 [1] : vector<16x128xf32> to vector<16xf32>
    %5 = vector.shape_cast %4 : vector<16xf32> to vector<16x1xf32>
    %cst_2 = arith.constant 3.125000e-02 : f32
    %6 = vector.broadcast %cst_2 : f32 to vector<16x1xf32>
    %7 = arith.mulf %2, %6 : vector<16x1xf32>
    %cst_3 = arith.constant 3.125000e-02 : f32
    %8 = vector.broadcast %cst_3 : f32 to vector<16x1xf32>
    %9 = arith.mulf %5, %8 : vector<16x1xf32>
    %10 = arith.mulf %7, %7 : vector<16x1xf32>
    %11 = arith.subf %9, %10 : vector<16x1xf32>
    %cst_4 = arith.constant 0.000000e+00 : f32
    %12 = vector.broadcast %cst_4 : f32 to vector<16x1xf32>
    %13 = arith.maximumf %11, %12 : vector<16x1xf32>
    %cst_5 = arith.constant 9.99999974E-6 : f32
    %14 = vector.broadcast %cst_5 : f32 to vector<16x1xf32>
    %15 = arith.addf %13, %14 : vector<16x1xf32>
    %16 = math.rsqrt %15 : vector<16x1xf32>
    %17 = vector.broadcast %7 : vector<16x1xf32> to vector<16x128xf32>
    %18 = arith.subf %0, %17 : vector<16x128xf32>
    %19 = vector.broadcast %16 : vector<16x1xf32> to vector<16x128xf32>
    %20 = arith.mulf %18, %19 : vector<16x128xf32>
    %c0_6 = arith.constant 0 : index
    %c0_7 = arith.constant 0 : index
    %21 = vector.load %arg2[%c0_6, %c0_7] : memref<1x128xf32, #tpu.memory_space<vmem>>, vector<1x128xf32>
    %22 = vector.broadcast %21 : vector<1x128xf32> to vector<16x128xf32>
    %23 = arith.mulf %20, %22 : vector<16x128xf32>
    %c0_8 = arith.constant 0 : index
    %c0_9 = arith.constant 0 : index
    %24 = vector.load %arg3[%c0_8, %c0_9] : memref<1x128xf32, #tpu.memory_space<vmem>>, vector<1x128xf32>
    %25 = vector.broadcast %24 : vector<1x128xf32> to vector<16x128xf32>
    %26 = arith.addf %23, %25 : vector<16x128xf32>
    %c0_10 = arith.constant 0 : index
    %c0_11 = arith.constant 0 : index
    %27 = vector.load %arg4[%c0_10, %c0_11] : memref<128x128xf32, #tpu.memory_space<vmem>>, vector<128x128xf32>
    %cst_12 = arith.constant dense<0.000000e+00> : vector<16x128xf32>
    %28 = tpu.matmul %26, %27, %cst_12 {dimension_numbers = #tpu.dot_dimension_numbers<[1], [0], [0], [1], [0, 0, 1, 1], [], []>} : vector<16x128xf32>, vector<128x128xf32>, vector<16x128xf32> -> vector<16x128xf32>
    %c0_13 = arith.constant 0 : index
    %c0_14 = arith.constant 0 : index
    %29 = vector.load %arg5[%c0_13, %c0_14] : memref<1x128xf32, #tpu.memory_space<vmem>>, vector<1x128xf32>
    %30 = vector.broadcast %29 : vector<1x128xf32> to vector<16x128xf32>
    %31 = arith.addf %28, %30 : vector<16x128xf32>
    %c0_15 = arith.constant 0 : index
    %c0_16 = arith.constant 0 : index
    %32 = vector.load %arg1[%c0_15, %c0_16] : memref<16x128xf32, #tpu.memory_space<vmem>>, vector<16x128xf32>
    %33 = arith.addf %32, %31 : vector<16x128xf32>
    %c0_17 = arith.constant 0 : index
    %c0_18 = arith.constant 0 : index
    %34 = vector.load %arg6[%c0_17, %c0_18] : memref<16x128xf32, #tpu.memory_space<vmem>>, vector<16x128xf32>
    tpu.vector_store %arg6[%c0_17, %c0_18], %33 {strides = array<i32>} : memref<16x128xf32, #tpu.memory_space<vmem>>, vector<16x128xf32>,
    return
  }
  func.func @transform_0(%arg0: i32) -> (i32, i32) {
    %c0_i32 = arith.constant 0 : i32
    %c0_i32_0 = arith.constant 0 : i32
    return %arg0, %c0_i32 : i32, i32
  }
  func.func @transform_1(%arg0: i32) -> (i32, i32) {
    %c0_i32 = arith.constant 0 : i32
    %c0_i32_0 = arith.constant 0 : i32
    %c0_i32_1 = arith.constant 0 : i32
    return %c0_i32, %c0_i32_0 : i32, i32
  }
  func.func @transform_2(%arg0: i32) -> (i32, i32) {
    %c0_i32 = arith.constant 0 : i32
    %c0_i32_0 = arith.constant 0 : i32
    %c0_i32_1 = arith.constant 0 : i32
    return %c0_i32, %c0_i32_0 : i32, i32
  }
  func.func @transform_3(%arg0: i32) -> (i32, i32) {
    %c0_i32 = arith.constant 0 : i32
    %c0_i32_0 = arith.constant 0 : i32
    %c0_i32_1 = arith.constant 0 : i32
    return %c0_i32, %c0_i32_0 : i32, i32
  }
  func.func @transform_4(%arg0: i32) -> (i32, i32) {
    %c0_i32 = arith.constant 0 : i32
    %c0_i32_0 = arith.constant 0 : i32
    %c0_i32_1 = arith.constant 0 : i32
    return %c0_i32, %c0_i32_0 : i32, i32
  }
  func.func @transform_5(%arg0: i32) -> (i32, i32) {
    %c0_i32 = arith.constant 0 : i32
    %c0_i32_0 = arith.constant 0 : i32
    return %arg0, %c0_i32 : i32, i32
  }
}

module attributes {stable_mosaic.version = 11 : i64} {
  func.func @kernel(%arg0: i32, %arg1: memref<16x128xf32, #tpu.memory_space<vmem>>, %arg2: memref<1x128xf32, #tpu.memory_space<vmem>>, %arg3: memref<1x128xf32, #tpu.memory_space<vmem>>, %arg4: memref<128x128xf32, #tpu.memory_space<vmem>>, %arg5: memref<1x128xf32, #tpu.memory_space<vmem>>, %arg6: memref<16x128xf32, #tpu.memory_space<vmem>>) attributes {dimension_semantics = [#tpu.dimension_semantics<parallel>], iteration_bounds = array<i64: 1>, scalar_prefetch = 0 : i64, scratch_operands = 0 : i64, tpu.core_type = #tpu.core_type<tc>, window_params = [{transform_indices = @transform_0, window_bounds = array<i64: 16, 128>}, {pipeline_mode = #tpu.pipeline_mode<synchronous>, transform_indices = @transform_1, window_bounds = array<i64: 1, 128>}, {pipeline_mode = #tpu.pipeline_mode<synchronous>, transform_indices = @transform_2, window_bounds = array<i64: 1, 128>}, {pipeline_mode = #tpu.pipeline_mode<synchronous>, transform_indices = @transform_3, window_bounds = array<i64: 128, 128>}, {pipeline_mode = #tpu.pipeline_mode<synchronous>, transform_indices = @transform_4, window_bounds = array<i64: 1, 128>}, {transform_indices = @transform_5, window_bounds = array<i64: 16, 128>}]} {
    %c0 = arith.constant 0 : index
    %c0_0 = arith.constant 0 : index
    %0 = vector.load %arg1[%c0, %c0_0] : memref<16x128xf32, #tpu.memory_space<vmem>>, vector<16x128xf32>
    %cst = arith.constant dense<0.000000e+00> : vector<16xf32>
    %1 = vector.multi_reduction <add>, %0, %cst [1] : vector<16x128xf32> to vector<16xf32>
    %2 = vector.shape_cast %1 : vector<16xf32> to vector<16x1xf32>
    %3 = arith.mulf %0, %0 : vector<16x128xf32>
    %cst_1 = arith.constant dense<0.000000e+00> : vector<16xf32>
    %4 = vector.multi_reduction <add>, %3, %cst_1 [1] : vector<16x128xf32> to vector<16xf32>
    %5 = vector.shape_cast %4 : vector<16xf32> to vector<16x1xf32>
    %cst_2 = arith.constant 3.125000e-02 : f32
    %6 = vector.broadcast %cst_2 : f32 to vector<16x1xf32>
    %7 = arith.mulf %2, %6 : vector<16x1xf32>
    %cst_3 = arith.constant 3.125000e-02 : f32
    %8 = vector.broadcast %cst_3 : f32 to vector<16x1xf32>
    %9 = arith.mulf %5, %8 : vector<16x1xf32>
    %10 = arith.mulf %7, %7 : vector<16x1xf32>
    %11 = arith.subf %9, %10 : vector<16x1xf32>
    %cst_4 = arith.constant 0.000000e+00 : f32
    %12 = vector.broadcast %cst_4 : f32 to vector<16x1xf32>
    %13 = arith.maximumf %11, %12 : vector<16x1xf32>
    %cst_5 = arith.constant 9.99999974E-6 : f32
    %14 = vector.broadcast %cst_5 : f32 to vector<16x1xf32>
    %15 = arith.addf %13, %14 : vector<16x1xf32>
    %16 = math.rsqrt %15 : vector<16x1xf32>
    %17 = vector.broadcast %7 : vector<16x1xf32> to vector<16x128xf32>
    %18 = arith.subf %0, %17 : vector<16x128xf32>
    %19 = vector.broadcast %16 : vector<16x1xf32> to vector<16x128xf32>
    %20 = arith.mulf %18, %19 : vector<16x128xf32>
    %c0_6 = arith.constant 0 : index
    %c0_7 = arith.constant 0 : index
    %21 = vector.load %arg2[%c0_6, %c0_7] : memref<1x128xf32, #tpu.memory_space<vmem>>, vector<1x128xf32>
    %22 = vector.broadcast %21 : vector<1x128xf32> to vector<16x128xf32>
    %23 = arith.mulf %20, %22 : vector<16x128xf32>
    %c0_8 = arith.constant 0 : index
    %c0_9 = arith.constant 0 : index
    %24 = vector.load %arg3[%c0_8, %c0_9] : memref<1x128xf32, #tpu.memory_space<vmem>>, vector<1x128xf32>
    %25 = vector.broadcast %24 : vector<1x128xf32> to vector<16x128xf32>
    %26 = arith.addf %23, %25 : vector<16x128xf32>
    %c0_10 = arith.constant 0 : index
    %c0_11 = arith.constant 0 : index
    %27 = vector.load %arg4[%c0_10, %c0_11] : memref<128x128xf32, #tpu.memory_space<vmem>>, vector<128x128xf32>
    %cst_12 = arith.constant dense<0.000000e+00> : vector<16x128xf32>
    %28 = tpu.matmul %26, %27, %cst_12 {dimension_numbers = #tpu.dot_dimension_numbers<[1], [0], [0], [1], [0, 0, 1, 1], [], []>} : vector<16x128xf32>, vector<128x128xf32>, vector<16x128xf32> -> vector<16x128xf32>
    %c0_13 = arith.constant 0 : index
    %c0_14 = arith.constant 0 : index
    %29 = vector.load %arg5[%c0_13, %c0_14] : memref<1x128xf32, #tpu.memory_space<vmem>>, vector<1x128xf32>
    %30 = vector.broadcast %29 : vector<1x128xf32> to vector<16x128xf32>
    %31 = arith.addf %28, %30 : vector<16x128xf32>
    %c0_15 = arith.constant 0 : index
    %c0_16 = arith.constant 0 : index
    %32 = vector.load %arg1[%c0_15, %c0_16] : memref<16x128xf32, #tpu.memory_space<vmem>>, vector<16x128xf32>
    %33 = arith.addf %32, %31 : vector<16x128xf32>
    %c0_17 = arith.constant 0 : index
    %c0_18 = arith.constant 0 : index
    %34 = vector.load %arg6[%c0_17, %c0_18] : memref<16x128xf32, #tpu.memory_space<vmem>>, vector<16x128xf32>
    tpu.vector_store %arg6[%c0_17, %c0_18], %33 {strides = array<i32>} : memref<16x128xf32, #tpu.memory_space<vmem>>, vector<16x128xf32>,
    return
  }
  func.func @transform_0(%arg0: i32) -> (i32, i32) {
    %c0_i32 = arith.constant 0 : i32
    %c0_i32_0 = arith.constant 0 : i32
    return %arg0, %c0_i32 : i32, i32
  }
  func.func @transform_1(%arg0: i32) -> (i32, i32) {
    %c0_i32 = arith.constant 0 : i32
    %c0_i32_0 = arith.constant 0 : i32
    %c0_i32_1 = arith.constant 0 : i32
    return %c0_i32, %c0_i32_0 : i32, i32
  }
  func.func @transform_2(%arg0: i32) -> (i32, i32) {
    %c0_i32 = arith.constant 0 : i32
    %c0_i32_0 = arith.constant 0 : i32
    %c0_i32_1 = arith.constant 0 : i32
    return %c0_i32, %c0_i32_0 : i32, i32
  }
  func.func @transform_3(%arg0: i32) -> (i32, i32) {
    %c0_i32 = arith.constant 0 : i32
    %c0_i32_0 = arith.constant 0 : i32
    %c0_i32_1 = arith.constant 0 : i32
    return %c0_i32, %c0_i32_0 : i32, i32
  }
  func.func @transform_4(%arg0: i32) -> (i32, i32) {
    %c0_i32 = arith.constant 0 : i32
    %c0_i32_0 = arith.constant 0 : i32
    %c0_i32_1 = arith.constant 0 : i32
    return %c0_i32, %c0_i32_0 : i32, i32
  }
  func.func @transform_5(%arg0: i32) -> (i32, i32) {
    %c0_i32 = arith.constant 0 : i32
    %c0_i32_0 = arith.constant 0 : i32
    return %arg0, %c0_i32 : i32, i32
  }
}

</mosaic_0001>

<bundles_post_ra>
// kernel: tpu_custom_call.1
= control target key start
LH: loop header
LB: loop body
LE: loop exit
PB: predicated region body
PF: predicated region fallthrough
CT: control target
= control target key end

     0   :  { %10 = vsyncpa [#allocation3], 0  ;;  %s489_s0 = inlined_call_operand.hbm [shape: f32[16,128], index: 0, kind: input, shape index: {}]   ;;  %s490_s1 = inlined_call_operand.vmem [shape: f32[1,128], index: 1, kind: input, shape index: {}]   ;;  %s491_s2 = inlined_call_operand.vmem [shape: f32[1,128], index: 2, kind: input, shape index: {}]   ;;  %s492_s3 = inlined_call_operand.hbm [shape: f32[128,128], index: 3, kind: input, shape index: {}]   ;;  %s493_s4 = inlined_call_operand.vmem [shape: f32[1,128], index: 4, kind: input, shape index: {}]   ;;  %s494_s5 = inlined_call_operand.hbm [shape: f32[16,128], index: 5, kind: output, shape index: {}]  }
   0x1   :  { %11 = vsyncpa [#allocation6], 0 }
   0x2   :  { %12 = vsyncpa [#allocation4], 0  ;;  %s386_s18 = smov [#allocation2]   ;;  %s314_s22 = scalar_lea.hbm %s489_s0, 256 }
   0x3   :  { %s18_s19 = sshll.u32 %s386_s18, 4  ;;  %p315_p0 = scmp.ne.s32.totalorder %s489_s0, %s314_s22  ;;  %s19_s19 = int_to_ptr.vmem [resolvable:$true] %s18_s19 }
   0x4   :  { %p318_p1 = scmp.lt.u32.totalorder %s314_s22, %s489_s0 }
   0x6   :  { %p320_p2 = pnand %p318_p1, %p315_p0 }
   0x8   :  { %323 = shalt.err (!%p320_p2)
}
   0x9   :  { %s324_s27 = scalar_lea.vmem %s19_s19, 256  ;;  %p329_p4 = scmp.lt.s32.totalorder %s19_s19, %s19_s19 }
   0xa   :  { %p325_p3 = scmp.ne.s32.totalorder %s19_s19, %s324_s27  ;;  %p330_p5 = scmp.lt.s32.totalorder %s324_s27, %s324_s27 }
   0xc   :  { %p331_p6 = por %p330_p5, %p329_p4 }
   0xe   :  { %p332_p7 = pnand %p331_p6, %p325_p3 }
  0x10   :  { %335 = shalt.err (!%p332_p7)
}
  0x11   :  { %s387_s28 = smov 128   ;;  %s388_s29 = smov 8  }
  0x12   :  { %24 = dma.hbm_to_vmem [thread:$0]  %s489_s0, 256, %s19_s19, [#allocation3], %s387_s28, %s387_s28, %s388_s29  }
  0x13   :  { %s389_s7 = smov [#allocation5]   ;;  %s336_s11 = scalar_lea.hbm %s492_s3, 2048 }
  0x14   :  { %s34_s8 = sshll.u32 %s389_s7, 4  ;;  %p337_p8 = scmp.ne.s32.totalorder %s492_s3, %s336_s11  ;;  %s35_s8 = int_to_ptr.vmem [resolvable:$true] %s34_s8 }
  0x15   :  { %p340_p9 = scmp.lt.u32.totalorder %s336_s11, %s492_s3 }
  0x17   :  { %p342_p10 = pnand %p340_p9, %p337_p8 }
  0x19   :  { %345 = shalt.err (!%p342_p10)
}
  0x1a   :  { %s346_s16 = scalar_lea.vmem %s35_s8, 2048  ;;  %p351_p12 = scmp.lt.s32.totalorder %s35_s8, %s35_s8 }
  0x1b   :  { %p347_p11 = scmp.ne.s32.totalorder %s35_s8, %s346_s16  ;;  %p352_p13 = scmp.lt.s32.totalorder %s346_s16, %s346_s16 }
  0x1d   :  { %p353_p0 = por %p352_p13, %p351_p12 }
  0x1f   :  { %p354_p1 = pnand %p353_p0, %p347_p11 }
  0x21   :  { %357 = shalt.err (!%p354_p1)
}
  0x22   :  { %40 = dma.hbm_to_vmem [thread:$0]  %s492_s3, 2048, %s35_s8, [#allocation6], %s387_s28, %s387_s28, %s388_s29  }
  0x23   :  { %380 = dma.done.wait [#allocation3], 256  }
  0x24   :  { %381 = vsyncadd [#allocation3], 4294967040 }
  0x25   :  { %382 = dma.done.wait [#allocation6], 2048  }
  0x26   :  { %383 = vsyncadd [#allocation6], 4294965248  ;;  %v451_v0 = vld [vmem:[#allocation2] sm:$0xff]  ;;  %v453_v1 = vld [vmem:[#allocation2 + $0x8] sm:$0xff] }
  0x27   :  { %v97_v2 = vld [vmem:[#allocation5] sm:$0xff]  ;;  %51 = vadd.xlane.f32.xlu0 %v451_v0  ;;  %v55_v3 = vmul.f32 %v451_v0, %v451_v0  ;;  %v98_v4 = vld [vmem:[#allocation5 + $0x8] sm:$0xff]  ;;  %v56_v6 = vmul.f32 %v453_v1, %v453_v1  ;;  %v99_v7 = vld [vmem:[#allocation5 + $0x10] sm:$0xff] }
  0x28   :  { %v273_v5 = vpack.c.bf16 %v98_v4, %v97_v2  ;;  %v100_v8 = vld [vmem:[#allocation5 + $0x18] sm:$0xff]  ;;  %v101_v10 = vld [vmem:[#allocation5 + $0x20] sm:$0xff]  ;;  %v102_v11 = vld [vmem:[#allocation5 + $0x28] sm:$0xff] }
  0x29   :  { %57 = vadd.xlane.f32.xlu1 %v55_v3  ;;  %v277_v9 = vpack.c.bf16 %v100_v8, %v99_v7  ;;  %v281_v12 = vpack.c.bf16 %v102_v11, %v101_v10  ;;  %v103_v13 = vld [vmem:[#allocation5 + $0x30] sm:$0xff]  ;;  %v104_v14 = vld [vmem:[#allocation5 + $0x38] sm:$0xff]  ;;  %v105_v16 = vld [vmem:[#allocation5 + $0x40] sm:$0xff] }
  0x2a   :  { %274 = vmatprep.subr.bf16.mxu0 %v273_v5  ;;  %v285_v15 = vpack.c.bf16 %v104_v14, %v103_v13  ;;  %v106_v17 = vld [vmem:[#allocation5 + $0x48] sm:$0xff]  ;;  %v107_v19 = vld [vmem:[#allocation5 + $0x50] sm:$0xff]  ;;  %v108_v20 = vld [vmem:[#allocation5 + $0x58] sm:$0xff] }
  0x2b   :  { %53 = vadd.xlane.f32.xlu0 %v453_v1  ;;  %276 = vmatpush3.bf16.msra.mxu0 %v273_v5  ;;  %v289_v18 = vpack.c.bf16 %v106_v17, %v105_v16  ;;  %v109_v21 = vld [vmem:[#allocation5 + $0x60] sm:$0xff]  ;;  %v293_v22 = vpack.c.bf16 %v108_v20, %v107_v19  ;;  %v110_v23 = vld [vmem:[#allocation5 + $0x68] sm:$0xff]  ;;  %v111_v25 = vld [vmem:[#allocation5 + $0x70] sm:$0xff] }
  0x2c   :  { %278 = vmatprep.subr.bf16.mxu0 %v277_v9  ;;  %v297_v24 = vpack.c.bf16 %v110_v23, %v109_v21  ;;  %v112_v26 = vld [vmem:[#allocation5 + $0x78] sm:$0xff]  ;;  %v217_v46 = vld [vmem:[%s490_s1] ss:$0 sm:$0xff]  ;;  %s390_s1 = smov [#allocation7]  }
  0x2d   :  { %59 = vadd.xlane.f32.xlu1 %v56_v6  ;;  %v301_v27 = vpack.c.bf16 %v112_v26, %v111_v25  ;;  %v218_v48 = vld [vmem:[%s491_s2] ss:$0 sm:$0xff]  ;;  %s204_s23 = sshll.u32 %s390_s1, 4  ;;  %s205_s23 = int_to_ptr.vmem [resolvable:$true] %s204_s23 }
  0x2e   :  { %v219_v56 = vld [vmem:[%s493_s4] ss:$0 sm:$0xff]  ;;  %s358_s2 = scalar_lea.vmem %s205_s23, 256  ;;  %p363_p3 = scmp.lt.s32.totalorder %s205_s23, %s205_s23 }
  0x2f   :  { %280 = vmatpush3.bf16.msra.mxu0 %v277_v9  ;;  %p359_p2 = scmp.ne.s32.totalorder %s205_s23, %s358_s2  ;;  %p364_p4 = scmp.lt.s32.totalorder %s358_s2, %s358_s2 }
  0x30   :  { %282 = vmatprep.subr.bf16.mxu0 %v281_v12 }
  0x31   :  { %p365_p5 = por %p364_p4, %p363_p3 }
  0x33   :  { %284 = vmatpush3.bf16.msra.mxu0 %v281_v12  ;;  %p366_p6 = pnand %p365_p5, %p359_p2 }
  0x34   :  { %286 = vmatprep.subr.bf16.mxu0 %v285_v15 }
  0x37   :  { %288 = vmatpush3.bf16.msra.mxu0 %v285_v15 }
  0x38   :  { %290 = vmatprep.subr.bf16.mxu0 %v289_v18 }
  0x3b   :  { %292 = vmatpush3.bf16.msra.mxu0 %v289_v18 }
  0x3c   :  { %294 = vmatprep.subr.bf16.mxu0 %v293_v22 }
  0x3f   :  { %296 = vmatpush3.bf16.msra.mxu0 %v293_v22 }
  0x40   :  { %298 = vmatprep.subr.bf16.mxu0 %v297_v24 }
  0x43   :  { %300 = vmatpush3.bf16.msra.mxu0 %v297_v24 }
  0x44   :  { %302 = vmatprep.subr.bf16.mxu0 %v301_v27 }
  0x47   :  { %304 = vmatpush3.bf16.msra.mxu0 %v301_v27 }
  0xb4   :  { %v52_v28 = vpop.xlane.xlu0 %51 }
  0xb5   :  { %v61_v29 = vmul.f32 0.03125, %v52_v28 }
  0xb6   :  { %v58_v30 = vpop.xlane.xlu1 %57 }
  0xb7   :  { %v65_v31 = vmul.f32 %v61_v29, %v61_v29  ;;  %v63_v32 = vmul.f32 0.03125, %v58_v30  ;;  %v75_v44 = vsub.f32 %v451_v0, %v61_v29 }
  0xb8   :  { %v54_v33 = vpop.xlane.xlu0 %53 }
  0xb9   :  { %v67_v34 = vsub.f32 %v63_v32, %v65_v31  ;;  %v62_v35 = vmul.f32 0.03125, %v54_v33 }
  0xba   :  { %v60_v36 = vpop.xlane.xlu1 %59 }
  0xbb   :  { %v69_v37 = vmax.f32 %v67_v34, 0.0  ;;  %v66_v38 = vmul.f32 %v62_v35, %v62_v35  ;;  %v64_v39 = vmul.f32 0.03125, %v60_v36  ;;  %v76_v49 = vsub.f32 %v453_v1, %v62_v35 }
  0xbd   :  { %v71_v40 = vadd.f32 1e-05, %v69_v37  ;;  %v68_v41 = vsub.f32 %v64_v39, %v66_v38 }
  0xbf   :  { %310 = vrsqrt.f32 %v71_v40  ;;  %v70_v42 = vmax.f32 %v68_v41, 0.0 }
  0xc1   :  { %v72_v43 = vadd.f32 1e-05, %v70_v42 }
  0xc3   :  { %312 = vrsqrt.f32 %v72_v43 }
  0xc9   :  { %v311_v45 = vpop.eup %310 }
  0xca   :  { %v77_v47 = vmul.f32 %v311_v45, %v75_v44 }
  0xcc   :  { %v86_v50 = vmul.f32 %v217_v46, %v77_v47 }
  0xcd   :  { %v313_v51 = vpop.eup %312 }
  0xce   :  { %v78_v52 = vmul.f32 %v313_v51, %v76_v49  ;;  %v95_v53 = vadd.f32 %v218_v48, %v86_v50 }
  0xd0   :  { %v87_v54 = vmul.f32 %v217_v46, %v78_v52  ;;  %270 = vmatprep.mubr.f32.mxu0 %v95_v53 }
  0xd2   :  { %v96_v55 = vadd.f32 %v218_v48, %v87_v54 }
  0xd4   :  { %271 = vmatmul.mubr.f32.vlgmr.msra.gmra.mrb[0].mxu0 %v96_v55 }
 0x1a7   :  { %v272_v57 = vpop.f32.mrb[0].mxu0 }
 0x1a8   :  { %v192_v58 = vadd.f32 %v272_v57, %v219_v56  ;;  %v186_v59 = vpop.f32.mrb[1].mxu0 }
 0x1a9   :  { %v187_v60 = vadd.f32 %v219_v56, %v186_v59 }
 0x1aa   :  { %v196_v61 = vadd.f32 %v192_v58, %v453_v1 }
 0x1ab   :  { %v195_v62 = vadd.f32 %v187_v60, %v451_v0 }
 0x1ac   :  { %198 = vst [vmem:[#allocation7 + $0x8] sm:$0xff] %v196_v61 }
 0x1ad   :  { %197 = vst [vmem:[#allocation7] sm:$0xff] %v195_v62 }
 0x1ae   :  { %369 = shalt.err (!%p366_p6)
}
 0x1af   :  { %s370_s25 = scalar_lea.hbm %s494_s5, 256 }
 0x1b0   :  { %p371_p7 = scmp.ne.s32.totalorder %s494_s5, %s370_s25  ;;  %p374_p8 = scmp.lt.u32.totalorder %s370_s25, %s494_s5 }
 0x1b2   :  { %p376_p9 = pnand %p374_p8, %p371_p7 }
 0x1b4   :  { %379 = shalt.err (!%p376_p9)
}
 0x1b5   :  { %210 = dma.vmem_to_hbm [thread:$0]  %s205_s23, 256, %s494_s5, [#allocation4], %s387_s28, %s387_s28, %s388_s29  }
 0x1b6   :  { %384 = dma.done.wait [#allocation4], 256  }
 0x1b7   :  { %385 = vsyncadd [#allocation4], 4294967040 }
 0x1b8   :  { %214 = vsyncpa [#allocation3], 1 }
 0x1b9   :  { %215 = vsyncpa [#allocation6], 1 }
 0x1ba   :  { %216 = vsyncpa [#allocation4], 1 }

// kernel: tpu_custom_call.1
= control target key start
LH: loop header
LB: loop body
LE: loop exit
PB: predicated region body
PF: predicated region fallthrough
CT: control target
= control target key end

     0   :  { %10 = vsyncpa [#allocation3], 0  ;;  %s489_s0 = inlined_call_operand.hbm [shape: f32[16,128], index: 0, kind: input, shape index: {}]   ;;  %s490_s1 = inlined_call_operand.vmem [shape: f32[1,128], index: 1, kind: input, shape index: {}]   ;;  %s491_s2 = inlined_call_operand.vmem [shape: f32[1,128], index: 2, kind: input, shape index: {}]   ;;  %s492_s3 = inlined_call_operand.hbm [shape: f32[128,128], index: 3, kind: input, shape index: {}]   ;;  %s493_s4 = inlined_call_operand.vmem [shape: f32[1,128], index: 4, kind: input, shape index: {}]   ;;  %s494_s5 = inlined_call_operand.hbm [shape: f32[16,128], index: 5, kind: output, shape index: {}]  }
   0x1   :  { %11 = vsyncpa [#allocation6], 0 }
   0x2   :  { %12 = vsyncpa [#allocation4], 0  ;;  %s386_s18 = smov [#allocation2]   ;;  %s314_s22 = scalar_lea.hbm %s489_s0, 256 }
   0x3   :  { %s18_s19 = sshll.u32 %s386_s18, 4  ;;  %p315_p0 = scmp.ne.s32.totalorder %s489_s0, %s314_s22  ;;  %s19_s19 = int_to_ptr.vmem [resolvable:$true] %s18_s19 }
   0x4   :  { %p318_p1 = scmp.lt.u32.totalorder %s314_s22, %s489_s0 }
   0x6   :  { %p320_p2 = pnand %p318_p1, %p315_p0 }
   0x8   :  { %323 = shalt.err (!%p320_p2)
}
   0x9   :  { %s324_s27 = scalar_lea.vmem %s19_s19, 256  ;;  %p329_p4 = scmp.lt.s32.totalorder %s19_s19, %s19_s19 }
   0xa   :  { %p325_p3 = scmp.ne.s32.totalorder %s19_s19, %s324_s27  ;;  %p330_p5 = scmp.lt.s32.totalorder %s324_s27, %s324_s27 }
   0xc   :  { %p331_p6 = por %p330_p5, %p329_p4 }
   0xe   :  { %p332_p7 = pnand %p331_p6, %p325_p3 }
  0x10   :  { %335 = shalt.err (!%p332_p7)
}
  0x11   :  { %s387_s28 = smov 128   ;;  %s388_s29 = smov 8  }
  0x12   :  { %24 = dma.hbm_to_vmem [thread:$0]  %s489_s0, 256, %s19_s19, [#allocation3], %s387_s28, %s387_s28, %s388_s29  }
  0x13   :  { %s389_s7 = smov [#allocation5]   ;;  %s336_s11 = scalar_lea.hbm %s492_s3, 2048 }
  0x14   :  { %s34_s8 = sshll.u32 %s389_s7, 4  ;;  %p337_p8 = scmp.ne.s32.totalorder %s492_s3, %s336_s11  ;;  %s35_s8 = int_to_ptr.vmem [resolvable:$true] %s34_s8 }
  0x15   :  { %p340_p9 = scmp.lt.u32.totalorder %s336_s11, %s492_s3 }
  0x17   :  { %p342_p10 = pnand %p340_p9, %p337_p8 }
  0x19   :  { %345 = shalt.err (!%p342_p10)
}
  0x1a   :  { %s346_s16 = scalar_lea.vmem %s35_s8, 2048  ;;  %p351_p12 = scmp.lt.s32.totalorder %s35_s8, %s35_s8 }
  0x1b   :  { %p347_p11 = scmp.ne.s32.totalorder %s35_s8, %s346_s16  ;;  %p352_p13 = scmp.lt.s32.totalorder %s346_s16, %s346_s16 }
  0x1d   :  { %p353_p0 = por %p352_p13, %p351_p12 }
  0x1f   :  { %p354_p1 = pnand %p353_p0, %p347_p11 }
  0x21   :  { %357 = shalt.err (!%p354_p1)
}
  0x22   :  { %40 = dma.hbm_to_vmem [thread:$0]  %s492_s3, 2048, %s35_s8, [#allocation6], %s387_s28, %s387_s28, %s388_s29  }
  0x23   :  { %380 = dma.done.wait [#allocation3], 256  }
  0x24   :  { %381 = vsyncadd [#allocation3], 4294967040 }
  0x25   :  { %382 = dma.done.wait [#allocation6], 2048  }
  0x26   :  { %383 = vsyncadd [#allocation6], 4294965248  ;;  %v451_v0 = vld [vmem:[#allocation2] sm:$0xff]  ;;  %v453_v1 = vld [vmem:[#allocation2 + $0x8] sm:$0xff] }
  0x27   :  { %v97_v2 = vld [vmem:[#allocation5] sm:$0xff]  ;;  %51 = vadd.xlane.f32.xlu0 %v451_v0  ;;  %v55_v3 = vmul.f32 %v451_v0, %v451_v0  ;;  %v98_v4 = vld [vmem:[#allocation5 + $0x8] sm:$0xff]  ;;  %v56_v6 = vmul.f32 %v453_v1, %v453_v1  ;;  %v99_v7 = vld [vmem:[#allocation5 + $0x10] sm:$0xff] }
  0x28   :  { %v273_v5 = vpack.c.bf16 %v98_v4, %v97_v2  ;;  %v100_v8 = vld [vmem:[#allocation5 + $0x18] sm:$0xff]  ;;  %v101_v10 = vld [vmem:[#allocation5 + $0x20] sm:$0xff]  ;;  %v102_v11 = vld [vmem:[#allocation5 + $0x28] sm:$0xff] }
  0x29   :  { %57 = vadd.xlane.f32.xlu1 %v55_v3  ;;  %v277_v9 = vpack.c.bf16 %v100_v8, %v99_v7  ;;  %v281_v12 = vpack.c.bf16 %v102_v11, %v101_v10  ;;  %v103_v13 = vld [vmem:[#allocation5 + $0x30] sm:$0xff]  ;;  %v104_v14 = vld [vmem:[#allocation5 + $0x38] sm:$0xff]  ;;  %v105_v16 = vld [vmem:[#allocation5 + $0x40] sm:$0xff] }
  0x2a   :  { %274 = vmatprep.subr.bf16.mxu0 %v273_v5  ;;  %v285_v15 = vpack.c.bf16 %v104_v14, %v103_v13  ;;  %v106_v17 = vld [vmem:[#allocation5 + $0x48] sm:$0xff]  ;;  %v107_v19 = vld [vmem:[#allocation5 + $0x50] sm:$0xff]  ;;  %v108_v20 = vld [vmem:[#allocation5 + $0x58] sm:$0xff] }
  0x2b   :  { %53 = vadd.xlane.f32.xlu0 %v453_v1  ;;  %276 = vmatpush3.bf16.msra.mxu0 %v273_v5  ;;  %v289_v18 = vpack.c.bf16 %v106_v17, %v105_v16  ;;  %v109_v21 = vld [vmem:[#allocation5 + $0x60] sm:$0xff]  ;;  %v293_v22 = vpack.c.bf16 %v108_v20, %v107_v19  ;;  %v110_v23 = vld [vmem:[#allocation5 + $0x68] sm:$0xff]  ;;  %v111_v25 = vld [vmem:[#allocation5 + $0x70] sm:$0xff] }
  0x2c   :  { %278 = vmatprep.subr.bf16.mxu0 %v277_v9  ;;  %v297_v24 = vpack.c.bf16 %v110_v23, %v109_v21  ;;  %v112_v26 = vld [vmem:[#allocation5 + $0x78] sm:$0xff]  ;;  %v217_v46 = vld [vmem:[%s490_s1] ss:$0 sm:$0xff]  ;;  %s390_s1 = smov [#allocation7]  }
  0x2d   :  { %59 = vadd.xlane.f32.xlu1 %v56_v6  ;;  %v301_v27 = vpack.c.bf16 %v112_v26, %v111_v25  ;;  %v218_v48 = vld [vmem:[%s491_s2] ss:$0 sm:$0xff]  ;;  %s204_s23 = sshll.u32 %s390_s1, 4  ;;  %s205_s23 = int_to_ptr.vmem [resolvable:$true] %s204_s23 }
  0x2e   :  { %v219_v56 = vld [vmem:[%s493_s4] ss:$0 sm:$0xff]  ;;  %s358_s2 = scalar_lea.vmem %s205_s23, 256  ;;  %p363_p3 = scmp.lt.s32.totalorder %s205_s23, %s205_s23 }
  0x2f   :  { %280 = vmatpush3.bf16.msra.mxu0 %v277_v9  ;;  %p359_p2 = scmp.ne.s32.totalorder %s205_s23, %s358_s2  ;;  %p364_p4 = scmp.lt.s32.totalorder %s358_s2, %s358_s2 }
  0x30   :  { %282 = vmatprep.subr.bf16.mxu0 %v281_v12 }
  0x31   :  { %p365_p5 = por %p364_p4, %p363_p3 }
  0x33   :  { %284 = vmatpush3.bf16.msra.mxu0 %v281_v12  ;;  %p366_p6 = pnand %p365_p5, %p359_p2 }
  0x34   :  { %286 = vmatprep.subr.bf16.mxu0 %v285_v15 }
  0x37   :  { %288 = vmatpush3.bf16.msra.mxu0 %v285_v15 }
  0x38   :  { %290 = vmatprep.subr.bf16.mxu0 %v289_v18 }
  0x3b   :  { %292 = vmatpush3.bf16.msra.mxu0 %v289_v18 }
  0x3c   :  { %294 = vmatprep.subr.bf16.mxu0 %v293_v22 }
  0x3f   :  { %296 = vmatpush3.bf16.msra.mxu0 %v293_v22 }
  0x40   :  { %298 = vmatprep.subr.bf16.mxu0 %v297_v24 }
  0x43   :  { %300 = vmatpush3.bf16.msra.mxu0 %v297_v24 }
  0x44   :  { %302 = vmatprep.subr.bf16.mxu0 %v301_v27 }
  0x47   :  { %304 = vmatpush3.bf16.msra.mxu0 %v301_v27 }
  0xb4   :  { %v52_v28 = vpop.xlane.xlu0 %51 }
  0xb5   :  { %v61_v29 = vmul.f32 0.03125, %v52_v28 }
  0xb6   :  { %v58_v30 = vpop.xlane.xlu1 %57 }
  0xb7   :  { %v65_v31 = vmul.f32 %v61_v29, %v61_v29  ;;  %v63_v32 = vmul.f32 0.03125, %v58_v30  ;;  %v75_v44 = vsub.f32 %v451_v0, %v61_v29 }
  0xb8   :  { %v54_v33 = vpop.xlane.xlu0 %53 }
  0xb9   :  { %v67_v34 = vsub.f32 %v63_v32, %v65_v31  ;;  %v62_v35 = vmul.f32 0.03125, %v54_v33 }
  0xba   :  { %v60_v36 = vpop.xlane.xlu1 %59 }
  0xbb   :  { %v69_v37 = vmax.f32 %v67_v34, 0.0  ;;  %v66_v38 = vmul.f32 %v62_v35, %v62_v35  ;;  %v64_v39 = vmul.f32 0.03125, %v60_v36  ;;  %v76_v49 = vsub.f32 %v453_v1, %v62_v35 }
  0xbd   :  { %v71_v40 = vadd.f32 1e-05, %v69_v37  ;;  %v68_v41 = vsub.f32 %v64_v39, %v66_v38 }
  0xbf   :  { %310 = vrsqrt.f32 %v71_v40  ;;  %v70_v42 = vmax.f32 %v68_v41, 0.0 }
  0xc1   :  { %v72_v43 = vadd.f32 1e-05, %v70_v42 }
  0xc3   :  { %312 = vrsqrt.f32 %v72_v43 }
  0xc9   :  { %v311_v45 = vpop.eup %310 }
  0xca   :  { %v77_v47 = vmul.f32 %v311_v45, %v75_v44 }
  0xcc   :  { %v86_v50 = vmul.f32 %v217_v46, %v77_v47 }
  0xcd   :  { %v313_v51 = vpop.eup %312 }
  0xce   :  { %v78_v52 = vmul.f32 %v313_v51, %v76_v49  ;;  %v95_v53 = vadd.f32 %v218_v48, %v86_v50 }
  0xd0   :  { %v87_v54 = vmul.f32 %v217_v46, %v78_v52  ;;  %270 = vmatprep.mubr.f32.mxu0 %v95_v53 }
  0xd2   :  { %v96_v55 = vadd.f32 %v218_v48, %v87_v54 }
  0xd4   :  { %271 = vmatmul.mubr.f32.vlgmr.msra.gmra.mrb[0].mxu0 %v96_v55 }
 0x1a7   :  { %v272_v57 = vpop.f32.mrb[0].mxu0 }
 0x1a8   :  { %v192_v58 = vadd.f32 %v272_v57, %v219_v56  ;;  %v186_v59 = vpop.f32.mrb[1].mxu0 }
 0x1a9   :  { %v187_v60 = vadd.f32 %v219_v56, %v186_v59 }
 0x1aa   :  { %v196_v61 = vadd.f32 %v192_v58, %v453_v1 }
 0x1ab   :  { %v195_v62 = vadd.f32 %v187_v60, %v451_v0 }
 0x1ac   :  { %198 = vst [vmem:[#allocation7 + $0x8] sm:$0xff] %v196_v61 }
 0x1ad   :  { %197 = vst [vmem:[#allocation7] sm:$0xff] %v195_v62 }
 0x1ae   :  { %369 = shalt.err (!%p366_p6)
}
 0x1af   :  { %s370_s25 = scalar_lea.hbm %s494_s5, 256 }
 0x1b0   :  { %p371_p7 = scmp.ne.s32.totalorder %s494_s5, %s370_s25  ;;  %p374_p8 = scmp.lt.u32.totalorder %s370_s25, %s494_s5 }
 0x1b2   :  { %p376_p9 = pnand %p374_p8, %p371_p7 }
 0x1b4   :  { %379 = shalt.err (!%p376_p9)
}
 0x1b5   :  { %210 = dma.vmem_to_hbm [thread:$0]  %s205_s23, 256, %s494_s5, [#allocation4], %s387_s28, %s387_s28, %s388_s29  }
 0x1b6   :  { %384 = dma.done.wait [#allocation4], 256  }
 0x1b7   :  { %385 = vsyncadd [#allocation4], 4294967040 }
 0x1b8   :  { %214 = vsyncpa [#allocation3], 1 }
 0x1b9   :  { %215 = vsyncpa [#allocation6], 1 }
 0x1ba   :  { %216 = vsyncpa [#allocation4], 1 }

</bundles_post_ra>
